<compile_context>
chip_gen: v7x
topology: tpu7x:2x2x1
jax: 0.10.0
libtpu: 0.0.40
codegen_flags: <defaults>
</compile_context>

<pallas_src>
import math

import jax
import jax.numpy as jnp
from jax.experimental import pallas as pl

LOG_SIG_MIN = -20.0
LOG_SIG_MAX = 2.0
HALF_LOG_2PI = 0.5 * math.log(2.0 * math.pi)


def _softplus(x):
    # single-exp stable softplus: max(x, 0) + log1p(exp(-|x|))
    return jnp.maximum(x, 0.0) + jnp.log1p(jnp.exp(-jnp.abs(x)))


# ---------------------------------------------------------------------------
# Fused PEARL forward kernel
# ---------------------------------------------------------------------------
def _make_pearl_kernel(T, N, B, L, A, H):
    def kernel(ctx_ref, obs_ref, eps_z_ref, eps_a_ref,
               ew1_ref, ew2_ref, ew3_ref,
               pw1o_ref, pw1z_ref, pw2_ref, pwh_ref,
               bias_ref,
               enc_out_ref, pol_out_ref):
        # -------- unpack packed biases (static row index + lane slice) -----
        eb1 = bias_ref[0:1, :H]
        eb2 = bias_ref[1:2, :H]
        eb3 = bias_ref[2:3, :2 * L]
        pb1 = bias_ref[3:4, :H]
        pb2 = bias_ref[4:5, :H]
        pbh = bias_ref[5:6, :2 * A]

        # -------- context encoder: one MLP pass for all tasks --------------
        ctx = ctx_ref[...]                                           # (T*N, C)
        h = jnp.maximum(
            jnp.dot(ctx, ew1_ref[...], preferred_element_type=jnp.float32)
            + eb1, 0.0)
        h = jnp.maximum(
            jnp.dot(h, ew2_ref[...], preferred_element_type=jnp.float32)
            + eb2, 0.0)
        enc_head = (jnp.dot(h, ew3_ref[...], preferred_element_type=jnp.float32)
                    + eb3)                                           # (T*N, 2L)
        mu = enc_head[:, :L]                                         # lane slice
        sigma_sq = jnp.maximum(_softplus(enc_head[:, L:]), 1e-7)     # clamp(1e-7)
        inv = 1.0 / sigma_sq

        # product of Gaussians, per task (tile-aligned (T, N, L) reduction)
        inv3 = inv.reshape(T, N, L)
        mu3 = mu.reshape(T, N, L)
        var_post = 1.0 / jnp.sum(inv3, axis=1)                       # (T, L)
        mean_post = var_post * jnp.sum(mu3 * inv3, axis=1)           # (T, L)

        # sample_z: rsample with externally supplied epsilon
        z = mean_post + jnp.sqrt(var_post) * eps_z_ref[...]          # (T, L)

        # slice-stores into the packed posterior output [z_means | z_vars]
        enc_out_ref[:, :L] = mean_post
        enc_out_ref[:, L:] = var_post

        # -------- policy: split first layer, z broadcast per task ----------
        obs = obs_ref[...]                                           # (T*B, Do)
        h1_obs = jnp.dot(obs, pw1o_ref[...],
                         preferred_element_type=jnp.float32)         # (T*B, H)
        z_h = (jnp.dot(z, pw1z_ref[...], preferred_element_type=jnp.float32)
               + pb1)                                                # (T, H) bias folded
        h1 = jnp.maximum(
            (h1_obs.reshape(T, B, H) + z_h[:, None, :]).reshape(T * B, H), 0.0)
        h2 = jnp.maximum(
            jnp.dot(h1, pw2_ref[...], preferred_element_type=jnp.float32)
            + pb2, 0.0)

        pol_head = (jnp.dot(h2, pwh_ref[...], preferred_element_type=jnp.float32)
                    + pbh)                                           # (T*B, 2A)
        mean = pol_head[:, :A]
        log_std = jnp.clip(pol_head[:, A:], LOG_SIG_MIN, LOG_SIG_MAX)
        std = jnp.exp(log_std)

        eps = eps_a_ref[...]
        pre_tanh = mean + std * eps                                  # reparameterized
        action = jnp.tanh(pre_tanh)

        # Normal(mean, std).log_prob(mean + std*eps) - log(1 - tanh^2 + 1e-6)
        # constant -0.5*log(2*pi) hoisted out of the lane-sum
        logp = (jnp.sum(-0.5 * eps * eps - log_std
                        - jnp.log(1.0 - action * action + 1e-6),
                        axis=1, keepdims=True)
                - A * HALF_LOG_2PI)                                  # (T*B, 1)

        # task_z = z repeated B times per task
        task_z = jnp.broadcast_to(z[:, None, :], (T, B, L)).reshape(T * B, L)

        # slice-stores into the single lane-dense policy output buffer
        pol_out_ref[:, 0 * A:1 * A] = action
        pol_out_ref[:, 1 * A:2 * A] = mean
        pol_out_ref[:, 2 * A:3 * A] = log_std
        pol_out_ref[:, 3 * A:4 * A] = pre_tanh
        pol_out_ref[:, 4 * A:4 * A + L] = task_z
        pol_out_ref[:, 4 * A + L:4 * A + L + 1] = logp

    return kernel


# ---------------------------------------------------------------------------
# parameter packing helpers (done once at prep time)
# ---------------------------------------------------------------------------
def _pack_biases(eb1, eb2, eb3, pb1, pb2, pbh):
    rows = (eb1, eb2, eb3, pb1, pb2, pbh)
    W = max(b.shape[1] for b in rows)
    padded = [jnp.pad(b, ((0, 0), (0, W - b.shape[1]))) for b in rows]
    return jnp.concatenate(padded, axis=0)                           # (6, W)


# ---------------------------------------------------------------------------
# PEARLAgent.forward wrapper
# ---------------------------------------------------------------------------
def pearl_forward(obs, context, enc_weights, pol_weights, bias_pack, eps_z, eps_a):
    T, B, obs_dim = obs.shape
    _, N, C = context.shape
    ew1, ew2, ew3 = enc_weights
    pw1o, pw1z, pw2, pwh = pol_weights
    H = ew2.shape[1]
    L = ew3.shape[1] // 2
    A = pwh.shape[1] // 2
    TB = T * B
    P = 4 * A + L + 1

    kernel = _make_pearl_kernel(T, N, B, L, A, H)

    enc_out, pol_out = pl.pallas_call(
        kernel,
        out_shape=(jax.ShapeDtypeStruct((T, 2 * L), jnp.float32),   # [z_means | z_vars]
                   jax.ShapeDtypeStruct((TB, P), jnp.float32)),     # packed policy out
    )(context.reshape(T * N, C), obs.reshape(TB, obs_dim), eps_z, eps_a,
      ew1, ew2, ew3, pw1o, pw1z, pw2, pwh, bias_pack)

    z_means = enc_out[:, :L]
    z_vars = enc_out[:, L:]
    action = pol_out[:, 0 * A:1 * A]
    mean = pol_out[:, 1 * A:2 * A]
    log_std = pol_out[:, 2 * A:3 * A]
    pre_tanh = pol_out[:, 3 * A:4 * A]
    task_z = pol_out[:, 4 * A:4 * A + L]
    log_prob = pol_out[:, 4 * A + L:4 * A + L + 1]

    policy_outputs = (action, mean, log_std, log_prob, pre_tanh)
    return policy_outputs, task_z, z_means, z_vars


# ---------------------------------------------------------------------------
# pure-JAX reference (for correctness check against the kernel)
# ---------------------------------------------------------------------------
def pearl_forward_ref(obs, context, enc_weights, pol_weights, bias_pack, eps_z, eps_a):
    ew1, ew2, ew3 = enc_weights
    pw1o, pw1z, pw2, pwh = pol_weights
    T, B, Do = obs.shape
    _, N, C = context.shape
    H = ew2.shape[1]
    L = ew3.shape[1] // 2
    A = pwh.shape[1] // 2

    eb1 = bias_pack[0:1, :H]
    eb2 = bias_pack[1:2, :H]
    eb3 = bias_pack[2:3, :2 * L]
    pb1 = bias_pack[3:4, :H]
    pb2 = bias_pack[4:5, :H]
    pbh = bias_pack[5:6, :2 * A]

    x = context.reshape(T * N, C)
    h = jax.nn.relu(x @ ew1 + eb1)
    h = jax.nn.relu(h @ ew2 + eb2)
    head = h @ ew3 + eb3
    mu = head[:, :L].reshape(T, N, L)
    s2 = jnp.maximum(jax.nn.softplus(head[:, L:]), 1e-7).reshape(T, N, L)
    z_vars = 1.0 / jnp.sum(1.0 / s2, axis=1)
    z_means = z_vars * jnp.sum(mu / s2, axis=1)
    z = z_means + jnp.sqrt(z_vars) * eps_z

    task_z = jnp.repeat(z, B, axis=0)
    obs_flat = obs.reshape(T * B, Do)
    h1 = jax.nn.relu(obs_flat @ pw1o + task_z @ pw1z + pb1)
    h2 = jax.nn.relu(h1 @ pw2 + pb2)
    ph = h2 @ pwh + pbh
    mean = ph[:, :A]
    log_std = jnp.clip(ph[:, A:], LOG_SIG_MIN, LOG_SIG_MAX)
    std = jnp.exp(log_std)
    pre = mean + std * eps_a
    act = jnp.tanh(pre)
    nlp = -0.5 * eps_a * eps_a - log_std - HALF_LOG_2PI
    lp = jnp.sum(nlp - jnp.log(1.0 - act * act + 1e-6), axis=1, keepdims=True)
    return (act, mean, log_std, lp, pre), task_z, z_means, z_vars


# ---------------------------------------------------------------------------
# deterministic parameter / input construction
# ---------------------------------------------------------------------------
def _init(key, shape, scale=0.1):
    return scale * jax.random.normal(key, shape, dtype=jnp.float32)


if __name__ == "__main__":
    # small shapes consistent with PEARL
    T, N, B = 2, 8, 8                 # tasks, context transitions, obs per task
    obs_dim, act_dim, latent = 16, 4, 8
    ctx_dim = obs_dim + act_dim + 1   # (o, a, r) — use_next_obs_in_context=False
    H = 32
    enc_out_dim = 2 * latent          # use_information_bottleneck=True

    key = jax.random.PRNGKey(0)
    keys = jax.random.split(key, 20)

    # context encoder MLP: ctx_dim -> H -> H -> 2*latent (merged mu|sigma head)
    ew1, eb1 = _init(keys[0], (ctx_dim, H)), _init(keys[1], (1, H))
    ew2, eb2 = _init(keys[2], (H, H)), _init(keys[3], (1, H))
    ew3, eb3 = _init(keys[4], (H, enc_out_dim)), _init(keys[5], (1, enc_out_dim))

    # policy MLP: (obs_dim + latent) -> H -> H -> (mean|log_std) merged head
    pol_in = obs_dim + latent
    pw1, pb1 = _init(keys[6], (pol_in, H)), _init(keys[7], (1, H))
    pw2, pb2 = _init(keys[8], (H, H)), _init(keys[9], (1, H))
    pwm, pbm = _init(keys[10], (H, act_dim)), _init(keys[11], (1, act_dim))
    pws, pbs = _init(keys[12], (H, act_dim)), _init(keys[13], (1, act_dim))
    pwh = jnp.concatenate([pwm, pws], axis=1)     # (H, 2A) merged head
    pbh = jnp.concatenate([pbm, pbs], axis=1)     # (1, 2A)

    enc_weights = (ew1, ew2, ew3)
    pol_weights = (pw1[:obs_dim, :], pw1[obs_dim:, :], pw2, pwh)  # w1 split: obs / z
    bias_pack = _pack_biases(eb1, eb2, eb3, pb1, pb2, pbh)        # single (6, W) DMA

    context = jax.random.normal(keys[14], (T, N, ctx_dim), dtype=jnp.float32)
    obs = jax.random.normal(keys[15], (T, B, obs_dim), dtype=jnp.float32)
    eps_z = jax.random.normal(keys[16], (T, latent), dtype=jnp.float32)
    eps_a = jax.random.normal(keys[17], (T * B, act_dim), dtype=jnp.float32)

    fwd = jax.jit(pearl_forward)
    (policy_outputs, task_z, z_means, z_vars) = fwd(
        obs, context, enc_weights, pol_weights, bias_pack, eps_z, eps_a)
    action, mean, log_std, log_prob, pre_tanh = policy_outputs
    jax.block_until_ready((action, mean, log_std, log_prob, pre_tanh,
                           task_z, z_means, z_vars))

    # shape checks
    assert action.shape == (T * B, act_dim)
    assert mean.shape == (T * B, act_dim)
    assert log_std.shape == (T * B, act_dim)
    assert pre_tanh.shape == (T * B, act_dim)
    assert log_prob.shape == (T * B, 1)
    assert task_z.shape == (T * B, latent)
    assert z_means.shape == (T, latent) and z_vars.shape == (T, latent)
    assert bool(jnp.all(jnp.isfinite(action))) and bool(jnp.all(jnp.isfinite(log_prob)))

    # numerical check against pure-JAX reference
    ref_pol, ref_task_z, ref_zm, ref_zv = pearl_forward_ref(
        obs, context, enc_weights, pol_weights, bias_pack, eps_z, eps_a)
    for got, want in list(zip(policy_outputs, ref_pol)) + [
            (task_z, ref_task_z), (z_means, ref_zm), (z_vars, ref_zv)]:
        assert bool(jnp.allclose(got, want, atol=1e-5, rtol=1e-5)), "mismatch vs reference"

    print("KERNEL_OK")
</pallas_src>

<mosaic_0001>
module attributes {stable_mosaic.version = 11 : i64} {
  func.func @kernel(%arg0: memref<16x21xf32, #tpu.memory_space<vmem>>, %arg1: memref<16x16xf32, #tpu.memory_space<vmem>>, %arg2: memref<2x8xf32, #tpu.memory_space<vmem>>, %arg3: memref<16x4xf32, #tpu.memory_space<vmem>>, %arg4: memref<21x32xf32, #tpu.memory_space<vmem>>, %arg5: memref<32x32xf32, #tpu.memory_space<vmem>>, %arg6: memref<32x16xf32, #tpu.memory_space<vmem>>, %arg7: memref<16x32xf32, #tpu.memory_space<vmem>>, %arg8: memref<8x32xf32, #tpu.memory_space<vmem>>, %arg9: memref<32x32xf32, #tpu.memory_space<vmem>>, %arg10: memref<32x8xf32, #tpu.memory_space<vmem>>, %arg11: memref<6x32xf32, #tpu.memory_space<vmem>>, %arg12: memref<2x16xf32, #tpu.memory_space<vmem>>, %arg13: memref<16x25xf32, #tpu.memory_space<vmem>>) attributes {dimension_semantics = [], scalar_prefetch = 0 : i64, scratch_operands = 0 : i64, tpu.core_type = #tpu.core_type<tc>} {
    %c0 = arith.constant 0 : index
    %c0_0 = arith.constant 0 : index
    %0 = vector.load %arg11[%c0, %c0_0] : memref<6x32xf32, #tpu.memory_space<vmem>>, vector<1x32xf32>
    %c1 = arith.constant 1 : index
    %c0_1 = arith.constant 0 : index
    %1 = vector.load %arg11[%c1, %c0_1] : memref<6x32xf32, #tpu.memory_space<vmem>>, vector<1x32xf32>
    %c2 = arith.constant 2 : index
    %c0_2 = arith.constant 0 : index
    %2 = vector.load %arg11[%c2, %c0_2] : memref<6x32xf32, #tpu.memory_space<vmem>>, vector<1x16xf32>
    %c3 = arith.constant 3 : index
    %c0_3 = arith.constant 0 : index
    %3 = vector.load %arg11[%c3, %c0_3] : memref<6x32xf32, #tpu.memory_space<vmem>>, vector<1x32xf32>
    %c4 = arith.constant 4 : index
    %c0_4 = arith.constant 0 : index
    %4 = vector.load %arg11[%c4, %c0_4] : memref<6x32xf32, #tpu.memory_space<vmem>>, vector<1x32xf32>
    %c5 = arith.constant 5 : index
    %c0_5 = arith.constant 0 : index
    %5 = vector.load %arg11[%c5, %c0_5] : memref<6x32xf32, #tpu.memory_space<vmem>>, vector<1x8xf32>
    %c0_6 = arith.constant 0 : index
    %c0_7 = arith.constant 0 : index
    %6 = vector.load %arg0[%c0_6, %c0_7] : memref<16x21xf32, #tpu.memory_space<vmem>>, vector<16x21xf32>
    %c0_8 = arith.constant 0 : index
    %c0_9 = arith.constant 0 : index
    %7 = vector.load %arg4[%c0_8, %c0_9] : memref<21x32xf32, #tpu.memory_space<vmem>>, vector<21x32xf32>
    %cst = arith.constant dense<0.000000e+00> : vector<16x32xf32>
    %8 = tpu.matmul %6, %7, %cst {dimension_numbers = #tpu.dot_dimension_numbers<[1], [0], [0], [1], [0, 0, 1, 1], [], []>} : vector<16x21xf32>, vector<21x32xf32>, vector<16x32xf32> -> vector<16x32xf32>
    %9 = vector.broadcast %0 : vector<1x32xf32> to vector<16x32xf32>
    %10 = arith.addf %8, %9 : vector<16x32xf32>
    %cst_10 = arith.constant 0.000000e+00 : f32
    %11 = vector.broadcast %cst_10 : f32 to vector<16x32xf32>
    %12 = arith.maximumf %10, %11 : vector<16x32xf32>
    %c0_11 = arith.constant 0 : index
    %c0_12 = arith.constant 0 : index
    %13 = vector.load %arg5[%c0_11, %c0_12] : memref<32x32xf32, #tpu.memory_space<vmem>>, vector<32x32xf32>
    %cst_13 = arith.constant dense<0.000000e+00> : vector<16x32xf32>
    %14 = tpu.matmul %12, %13, %cst_13 {dimension_numbers = #tpu.dot_dimension_numbers<[1], [0], [0], [1], [0, 0, 1, 1], [], []>} : vector<16x32xf32>, vector<32x32xf32>, vector<16x32xf32> -> vector<16x32xf32>
    %15 = vector.broadcast %1 : vector<1x32xf32> to vector<16x32xf32>
    %16 = arith.addf %14, %15 : vector<16x32xf32>
    %cst_14 = arith.constant 0.000000e+00 : f32
    %17 = vector.broadcast %cst_14 : f32 to vector<16x32xf32>
    %18 = arith.maximumf %16, %17 : vector<16x32xf32>
    %c0_15 = arith.constant 0 : index
    %c0_16 = arith.constant 0 : index
    %19 = vector.load %arg6[%c0_15, %c0_16] : memref<32x16xf32, #tpu.memory_space<vmem>>, vector<32x16xf32>
    %cst_17 = arith.constant dense<0.000000e+00> : vector<16x16xf32>
    %20 = tpu.matmul %18, %19, %cst_17 {dimension_numbers = #tpu.dot_dimension_numbers<[1], [0], [0], [1], [0, 0, 1, 1], [], []>} : vector<16x32xf32>, vector<32x16xf32>, vector<16x16xf32> -> vector<16x16xf32>
    %21 = vector.broadcast %2 : vector<1x16xf32> to vector<16x16xf32>
    %22 = arith.addf %20, %21 : vector<16x16xf32>
    %23 = vector.extract_strided_slice %22 {offsets = [0, 0], sizes = [16, 8], strides = [1, 1]} : vector<16x16xf32> to vector<16x8xf32>
    %24 = vector.extract_strided_slice %22 {offsets = [0, 8], sizes = [16, 8], strides = [1, 1]} : vector<16x16xf32> to vector<16x8xf32>
    %cst_18 = arith.constant 0.000000e+00 : f32
    %25 = vector.broadcast %cst_18 : f32 to vector<16x8xf32>
    %26 = arith.maximumf %24, %25 : vector<16x8xf32>
    %27 = math.absf %24 : vector<16x8xf32>
    %cst_19 = arith.constant 0.000000e+00 : f32
    %28 = vector.broadcast %cst_19 : f32 to vector<16x8xf32>
    %29 = arith.subf %28, %27 : vector<16x8xf32>
    %30 = math.exp %29 : vector<16x8xf32>
    %31 = math.log1p %30 : vector<16x8xf32>
    %32 = arith.addf %26, %31 : vector<16x8xf32>
    %cst_20 = arith.constant 1.000000e-07 : f32
    %33 = vector.broadcast %cst_20 : f32 to vector<16x8xf32>
    %34 = arith.maximumf %32, %33 : vector<16x8xf32>
    %cst_21 = arith.constant 1.000000e+00 : f32
    %35 = vector.broadcast %cst_21 : f32 to vector<16x8xf32>
    %36 = arith.divf %35, %34 : vector<16x8xf32>
    %37 = vector.shape_cast %36 : vector<16x8xf32> to vector<2x8x8xf32>
    %38 = vector.shape_cast %23 : vector<16x8xf32> to vector<2x8x8xf32>
    %cst_22 = arith.constant dense<0.000000e+00> : vector<2x8xf32>
    %39 = vector.multi_reduction <add>, %37, %cst_22 [1] : vector<2x8x8xf32> to vector<2x8xf32>
    %cst_23 = arith.constant 1.000000e+00 : f32
    %40 = vector.broadcast %cst_23 : f32 to vector<2x8xf32>
    %41 = arith.divf %40, %39 : vector<2x8xf32>
    %42 = arith.mulf %38, %37 : vector<2x8x8xf32>
    %cst_24 = arith.constant dense<0.000000e+00> : vector<2x8xf32>
    %43 = vector.multi_reduction <add>, %42, %cst_24 [1] : vector<2x8x8xf32> to vector<2x8xf32>
    %44 = arith.mulf %41, %43 : vector<2x8xf32>
    %45 = math.sqrt %41 : vector<2x8xf32>
    %c0_25 = arith.constant 0 : index
    %c0_26 = arith.constant 0 : index
    %46 = vector.load %arg2[%c0_25, %c0_26] : memref<2x8xf32, #tpu.memory_space<vmem>>, vector<2x8xf32>
    %47 = arith.mulf %45, %46 : vector<2x8xf32>
    %48 = arith.addf %44, %47 : vector<2x8xf32>
    %c0_27 = arith.constant 0 : index
    %c0_28 = arith.constant 0 : index
    %49 = vector.load %arg12[%c0_27, %c0_28] : memref<2x16xf32, #tpu.memory_space<vmem>>, vector<2x8xf32>
    tpu.vector_store %arg12[%c0_27, %c0_28], %44 {strides = array<i32>} : memref<2x16xf32, #tpu.memory_space<vmem>>, vector<2x8xf32>,
    %c0_29 = arith.constant 0 : index
    %c8 = arith.constant 8 : index
    %50 = vector.load %arg12[%c0_29, %c8] : memref<2x16xf32, #tpu.memory_space<vmem>>, vector<2x8xf32>
    tpu.vector_store %arg12[%c0_29, %c8], %41 {strides = array<i32>} : memref<2x16xf32, #tpu.memory_space<vmem>>, vector<2x8xf32>,
    %c0_30 = arith.constant 0 : index
    %c0_31 = arith.constant 0 : index
    %51 = vector.load %arg1[%c0_30, %c0_31] : memref<16x16xf32, #tpu.memory_space<vmem>>, vector<16x16xf32>
    %c0_32 = arith.constant 0 : index
    %c0_33 = arith.constant 0 : index
    %52 = vector.load %arg7[%c0_32, %c0_33] : memref<16x32xf32, #tpu.memory_space<vmem>>, vector<16x32xf32>
    %cst_34 = arith.constant dense<0.000000e+00> : vector<16x32xf32>
    %53 = tpu.matmul %51, %52, %cst_34 {dimension_numbers = #tpu.dot_dimension_numbers<[1], [0], [0], [1], [0, 0, 1, 1], [], []>} : vector<16x16xf32>, vector<16x32xf32>, vector<16x32xf32> -> vector<16x32xf32>
    %c0_35 = arith.constant 0 : index
    %c0_36 = arith.constant 0 : index
    %54 = vector.load %arg8[%c0_35, %c0_36] : memref<8x32xf32, #tpu.memory_space<vmem>>, vector<8x32xf32>
    %cst_37 = arith.constant dense<0.000000e+00> : vector<2x32xf32>
    %55 = tpu.matmul %48, %54, %cst_37 {dimension_numbers = #tpu.dot_dimension_numbers<[1], [0], [0], [1], [0, 0, 1, 1], [], []>} : vector<2x8xf32>, vector<8x32xf32>, vector<2x32xf32> -> vector<2x32xf32>
    %56 = vector.broadcast %3 : vector<1x32xf32> to vector<2x32xf32>
    %57 = arith.addf %55, %56 : vector<2x32xf32>
    %58 = vector.shape_cast %53 : vector<16x32xf32> to vector<2x8x32xf32>
    %59 = vector.shape_cast %57 : vector<2x32xf32> to vector<2x1x32xf32>
    %60 = vector.broadcast %59 : vector<2x1x32xf32> to vector<2x8x32xf32>
    %61 = arith.addf %58, %60 : vector<2x8x32xf32>
    %62 = vector.shape_cast %61 : vector<2x8x32xf32> to vector<16x32xf32>
    %cst_38 = arith.constant 0.000000e+00 : f32
    %63 = vector.broadcast %cst_38 : f32 to vector<16x32xf32>
    %64 = arith.maximumf %62, %63 : vector<16x32xf32>
    %c0_39 = arith.constant 0 : index
    %c0_40 = arith.constant 0 : index
    %65 = vector.load %arg9[%c0_39, %c0_40] : memref<32x32xf32, #tpu.memory_space<vmem>>, vector<32x32xf32>
    %cst_41 = arith.constant dense<0.000000e+00> : vector<16x32xf32>
    %66 = tpu.matmul %64, %65, %cst_41 {dimension_numbers = #tpu.dot_dimension_numbers<[1], [0], [0], [1], [0, 0, 1, 1], [], []>} : vector<16x32xf32>, vector<32x32xf32>, vector<16x32xf32> -> vector<16x32xf32>
    %67 = vector.broadcast %4 : vector<1x32xf32> to vector<16x32xf32>
    %68 = arith.addf %66, %67 : vector<16x32xf32>
    %cst_42 = arith.constant 0.000000e+00 : f32
    %69 = vector.broadcast %cst_42 : f32 to vector<16x32xf32>
    %70 = arith.maximumf %68, %69 : vector<16x32xf32>
    %c0_43 = arith.constant 0 : index
    %c0_44 = arith.constant 0 : index
    %71 = vector.load %arg10[%c0_43, %c0_44] : memref<32x8xf32, #tpu.memory_space<vmem>>, vector<32x8xf32>
    %cst_45 = arith.constant dense<0.000000e+00> : vector<16x8xf32>
    %72 = tpu.matmul %70, %71, %cst_45 {dimension_numbers = #tpu.dot_dimension_numbers<[1], [0], [0], [1], [0, 0, 1, 1], [], []>} : vector<16x32xf32>, vector<32x8xf32>, vector<16x8xf32> -> vector<16x8xf32>
    %73 = vector.broadcast %5 : vector<1x8xf32> to vector<16x8xf32>
    %74 = arith.addf %72, %73 : vector<16x8xf32>
    %75 = vector.extract_strided_slice %74 {offsets = [0, 0], sizes = [16, 4], strides = [1, 1]} : vector<16x8xf32> to vector<16x4xf32>
    %76 = vector.extract_strided_slice %74 {offsets = [0, 4], sizes = [16, 4], strides = [1, 1]} : vector<16x8xf32> to vector<16x4xf32>
    %cst_46 = arith.constant -2.000000e+01 : f32
    %cst_47 = arith.constant 2.000000e+00 : f32
    %77 = vector.broadcast %cst_46 : f32 to vector<16x4xf32>
    %78 = arith.maximumf %77, %76 : vector<16x4xf32>
    %79 = vector.broadcast %cst_47 : f32 to vector<16x4xf32>
    %80 = arith.minimumf %79, %78 : vector<16x4xf32>
    %81 = math.exp %80 : vector<16x4xf32>
    %c0_48 = arith.constant 0 : index
    %c0_49 = arith.constant 0 : index
    %82 = vector.load %arg3[%c0_48, %c0_49] : memref<16x4xf32, #tpu.memory_space<vmem>>, vector<16x4xf32>
    %83 = arith.mulf %81, %82 : vector<16x4xf32>
    %84 = arith.addf %75, %83 : vector<16x4xf32>
    %85 = math.tanh %84 : vector<16x4xf32>
    %cst_50 = arith.constant -5.000000e-01 : f32
    %86 = vector.broadcast %cst_50 : f32 to vector<16x4xf32>
    %87 = arith.mulf %86, %82 : vector<16x4xf32>
    %88 = arith.mulf %87, %82 : vector<16x4xf32>
    %89 = arith.subf %88, %80 : vector<16x4xf32>
    %90 = arith.mulf %85, %85 : vector<16x4xf32>
    %cst_51 = arith.constant 1.000000e+00 : f32
    %91 = vector.broadcast %cst_51 : f32 to vector<16x4xf32>
    %92 = arith.subf %91, %90 : vector<16x4xf32>
    %cst_52 = arith.constant 9.99999997E-7 : f32
    %93 = vector.broadcast %cst_52 : f32 to vector<16x4xf32>
    %94 = arith.addf %92, %93 : vector<16x4xf32>
    %95 = math.log %94 : vector<16x4xf32>
    %96 = arith.subf %89, %95 : vector<16x4xf32>
    %cst_53 = arith.constant dense<0.000000e+00> : vector<16xf32>
    %97 = vector.multi_reduction <add>, %96, %cst_53 [1] : vector<16x4xf32> to vector<16xf32>
    %98 = vector.shape_cast %97 : vector<16xf32> to vector<16x1xf32>
    %cst_54 = arith.constant 3.67575407 : f32
    %99 = vector.broadcast %cst_54 : f32 to vector<16x1xf32>
    %100 = arith.subf %98, %99 : vector<16x1xf32>
    %101 = vector.shape_cast %48 : vector<2x8xf32> to vector<2x1x8xf32>
    %102 = vector.shape_cast %101 : vector<2x1x8xf32> to vector<2x1x8xf32>
    %103 = vector.broadcast %102 : vector<2x1x8xf32> to vector<2x8x8xf32>
    %104 = vector.shape_cast %103 : vector<2x8x8xf32> to vector<16x8xf32>
    %c0_55 = arith.constant 0 : index
    %c0_56 = arith.constant 0 : index
    %105 = vector.load %arg13[%c0_55, %c0_56] : memref<16x25xf32, #tpu.memory_space<vmem>>, vector<16x4xf32>
    tpu.vector_store %arg13[%c0_55, %c0_56], %85 {strides = array<i32>} : memref<16x25xf32, #tpu.memory_space<vmem>>, vector<16x4xf32>,
    %c0_57 = arith.constant 0 : index
    %c4_58 = arith.constant 4 : index
    %106 = vector.load %arg13[%c0_57, %c4_58] : memref<16x25xf32, #tpu.memory_space<vmem>>, vector<16x4xf32>
    tpu.vector_store %arg13[%c0_57, %c4_58], %75 {strides = array<i32>} : memref<16x25xf32, #tpu.memory_space<vmem>>, vector<16x4xf32>,
    %c0_59 = arith.constant 0 : index
    %c8_60 = arith.constant 8 : index
    %107 = vector.load %arg13[%c0_59, %c8_60] : memref<16x25xf32, #tpu.memory_space<vmem>>, vector<16x4xf32>
    tpu.vector_store %arg13[%c0_59, %c8_60], %80 {strides = array<i32>} : memref<16x25xf32, #tpu.memory_space<vmem>>, vector<16x4xf32>,
    %c0_61 = arith.constant 0 : index
    %c12 = arith.constant 12 : index
    %108 = vector.load %arg13[%c0_61, %c12] : memref<16x25xf32, #tpu.memory_space<vmem>>, vector<16x4xf32>
    tpu.vector_store %arg13[%c0_61, %c12], %84 {strides = array<i32>} : memref<16x25xf32, #tpu.memory_space<vmem>>, vector<16x4xf32>,
    %c0_62 = arith.constant 0 : index
    %c16 = arith.constant 16 : index
    %109 = vector.load %arg13[%c0_62, %c16] : memref<16x25xf32, #tpu.memory_space<vmem>>, vector<16x8xf32>
    tpu.vector_store %arg13[%c0_62, %c16], %104 {strides = array<i32>} : memref<16x25xf32, #tpu.memory_space<vmem>>, vector<16x8xf32>,
    %c0_63 = arith.constant 0 : index
    %c24 = arith.constant 24 : index
    %110 = vector.load %arg13[%c0_63, %c24] : memref<16x25xf32, #tpu.memory_space<vmem>>, vector<16x1xf32>
    tpu.vector_store %arg13[%c0_63, %c24], %100 {strides = array<i32>} : memref<16x25xf32, #tpu.memory_space<vmem>>, vector<16x1xf32>,
    return
  }
}

</mosaic_0001>

<bundles_post_ra>
// kernel: pearl_forward.1
= control target key start
LH: loop header
LB: loop body
LE: loop exit
PB: predicated region body
PF: predicated region fallthrough
CT: control target
= control target key end

     0   :  { %19 = vsyncpa [#allocation3], 0  ;;  %s1588_s0 = inlined_call_operand.hbm [shape: f32[16,21], index: 0, kind: input, shape index: {}]   ;;  %s1589_s1 = inlined_call_operand.hbm [shape: f32[16,16], index: 1, kind: input, shape index: {}]   ;;  %s1590_s2 = inlined_call_operand.vmem [shape: f32[2,8], index: 2, kind: input, shape index: {}]   ;;  %s1591_s3 = inlined_call_operand.vmem [shape: f32[16,4], index: 3, kind: input, shape index: {}]   ;;  %s1592_s4 = inlined_call_operand.vmem [shape: f32[21,32], index: 4, kind: input, shape index: {}]   ;;  %s1593_s5 = inlined_call_operand.vmem [shape: f32[32,32], index: 5, kind: input, shape index: {}]   ;;  %s1594_s6 = inlined_call_operand.vmem [shape: f32[32,16], index: 6, kind: input, shape index: {}]   ;;  %s1595_s7 = inlined_call_operand.vmem [shape: f32[16,32], index: 7, kind: input, shape index: {}]   ;;  %s1596_s8 = inlined_call_operand.vmem [shape: f32[8,32], index: 8, kind: input, shape index: {}]   ;;  %s1597_s9 = inlined_call_operand.vmem [shape: f32[32,32], index: 9, kind: input, shape index: {}]   ;;  %s1598_s10 = inlined_call_operand.vmem [shape: f32[32,8], index: 10, kind: input, shape index: {}]   ;;  %s1599_s11 = inlined_call_operand.vmem [shape: f32[6,32], index: 11, kind: input, shape index: {}]   ;;  %s1600_s12 = inlined_call_operand.vmem [shape: f32[2,16], index: 12, kind: output, shape index: {0}]   ;;  %s1601_s13 = inlined_call_operand.vmem [shape: f32[16,25], index: 13, kind: output, shape index: {1}]  }
   0x1   :  { %20 = vsyncpa [#allocation5], 0  ;;  %s1259_s25 = smov [#allocation2]   ;;  %s1211_s29 = scalar_lea.hbm %s1588_s0, 256 }
   0x2   :  { %s26_s26 = sshll.u32 %s1259_s25, 4  ;;  %p1212_p0 = scmp.ne.s32.totalorder %s1588_s0, %s1211_s29  ;;  %s27_s26 = int_to_ptr.vmem [resolvable:$true] %s26_s26 }
   0x3   :  { %p1215_p1 = scmp.lt.u32.totalorder %s1211_s29, %s1588_s0 }
   0x5   :  { %p1217_p2 = pnand %p1215_p1, %p1212_p0 }
   0x7   :  { %1220 = shalt.err (!%p1217_p2)
}
   0x8   :  { %s1221_s17 = scalar_lea.vmem %s27_s26, 256  ;;  %p1226_p4 = scmp.lt.s32.totalorder %s27_s26, %s27_s26 }
   0x9   :  { %p1222_p3 = scmp.ne.s32.totalorder %s27_s26, %s1221_s17  ;;  %p1227_p5 = scmp.lt.s32.totalorder %s1221_s17, %s1221_s17 }
   0xb   :  { %p1228_p6 = por %p1227_p5, %p1226_p4 }
   0xd   :  { %p1229_p7 = pnand %p1228_p6, %p1222_p3 }
   0xf   :  { %1232 = shalt.err (!%p1229_p7)
}
  0x10   :  { %s1260_s18 = smov 128   ;;  %s1261_s19 = smov 8  }
  0x11   :  { %32 = dma.hbm_to_vmem [thread:$0]  %s1588_s0, 256, %s27_s26, [#allocation3], %s1260_s18, %s1260_s18, %s1261_s19  }
  0x12   :  { %s1262_s22 = smov [#allocation4]   ;;  %s1233_s27 = scalar_lea.hbm %s1589_s1, 256 }
  0x13   :  { %s38_s23 = sshll.u32 %s1262_s22, 4  ;;  %p1234_p8 = scmp.ne.s32.totalorder %s1589_s1, %s1233_s27  ;;  %s39_s23 = int_to_ptr.vmem [resolvable:$true] %s38_s23 }
  0x14   :  { %p1237_p9 = scmp.lt.u32.totalorder %s1233_s27, %s1589_s1 }
  0x16   :  { %p1239_p10 = pnand %p1237_p9, %p1234_p8 }
  0x18   :  { %1242 = shalt.err (!%p1239_p10)
}
  0x19   :  { %s1243_s15 = scalar_lea.vmem %s39_s23, 256  ;;  %p1248_p12 = scmp.lt.s32.totalorder %s39_s23, %s39_s23 }
  0x1a   :  { %p1244_p11 = scmp.ne.s32.totalorder %s39_s23, %s1243_s15  ;;  %p1249_p13 = scmp.lt.s32.totalorder %s1243_s15, %s1243_s15 }
  0x1c   :  { %p1250_p0 = por %p1249_p13, %p1248_p12 }
  0x1e   :  { %p1251_p1 = pnand %p1250_p0, %p1244_p11 }
  0x20   :  { %1254 = shalt.err (!%p1251_p1)
}
  0x21   :  { %44 = dma.hbm_to_vmem [thread:$0]  %s1589_s1, 256, %s39_s23, [#allocation5], %s1260_s18, %s1260_s18, %s1261_s19  }
  0x22   :  { %1255 = dma.done.wait [#allocation3], 256  }
  0x23   :  { %1256 = vsyncadd [#allocation3], 4294967040 }
  0x24   :  { %1257 = dma.done.wait [#allocation5], 256  }
  0x25   :  { %1258 = vsyncadd [#allocation5], 4294967040  ;;  %vm86_vm0 = vcmask 171008   ;;  %v79_v0 = vld [vmem:[%s1592_s4] sm:$0xff]  ;;  %v80_v1 = vld [vmem:[%s1592_s4 + $0x8] sm:$0xff]  ;;  %vm93_vm1 = vcmask 1044480  }
  0x26   :  { %v1128_v2 = vpack.c.bf16 %v80_v1, %v79_v0  ;;  %v77_v3 = vld [vmem:[#allocation2] sm:$0xff]  ;;  %v81_v5 = vld [vmem:[%s1592_s4 + $0x10] sm:$0x1f]  ;;  %v175_v6 = vld [vmem:[%s1593_s5 + $0x8] sm:$0xff]  ;;  %vm182_vm2 = vcmask 261120   ;;  %s1263_s23 = smov 120  }
  0x27   :  { %v174_v4 = vld [vmem:[%s1593_s5] sm:$0xff]  ;;  %1069 = vmatprep.mubr.msk.f32.mxu0 %vm86_vm0, %v77_v3  ;;  %v78_v8 = vld [vmem:[#allocation2 + $0x8] sm:$0xff]  ;;  %v176_v9 = vld [vmem:[%s1593_s5 + $0x10] sm:$0xff]  ;;  %vm420_vm5 = vcmask 64512   ;;  %vm492_vm6 = vcmask 130048   ;;  %vm1265_vm7 = vmmov 0  }
  0x28   :  { %1129 = vmatprep.subr.bf16.mxu0 %v1128_v2  ;;  %v1132_v7 = vpack.c.bf16 %v175_v6, %v174_v4  ;;  %v177_v10 = vld [vmem:[%s1593_s5 + $0x18] sm:$0xff]  ;;  %v266_v12 = vld [vmem:[%s1594_s6] sm:$0xff]  ;;  %v267_v13 = vld [vmem:[%s1594_s6 + $0x8] sm:$0xff]  ;;  %vm391_vm8 = vcmask 130112   ;;  %vm475_vm13 = vcmask 1041409   ;;  %s1267_s29 = smov 4  }
  0x29   :  { %1131 = vmatpush3.bf16.msra.mxu0 %v1128_v2  ;;  %v1136_v11 = vpack.c.bf16 %v177_v10, %v176_v9  ;;  %v1140_v14 = vpack.c.bf16 %v267_v13, %v266_v12  ;;  %v1006_v15 = vld [vmem:[%s1599_s11] ss:$0 sm:$0xff]  ;;  %v268_v22 = vld [vmem:[%s1594_s6 + $0x10] sm:$0xff]  ;;  %v269_v23 = vld [vmem:[%s1594_s6 + $0x18] sm:$0xff]  ;;  %vm932_vm14 = vcmask 31744   ;;  %vm959_vm15 = vcmask 64544  }
  0x2a   :  { %1067 = vmatprep.subr.msk.mxu0 %vm93_vm1, %v81_v5  ;;  %1133 = vmatprep.subr.bf16.mxu1 %v1132_v7  ;;  %v1144_v24 = vpack.c.bf16 %v269_v23, %v268_v22  ;;  %v1409_v25 = vld [vmem:[%s1590_s2] sm:$0x3]  ;;  %v1013_v34 = vld [vmem:[%s1599_s11 + $0x2] ss:$0 sm:$0xff]  ;;  %v491_v22 = vld [vmem:[%s1595_s7 + $0x8] sm:$0xff] }
  0x2b   :  { %1135 = vmatpush3.bf16.msra.mxu1 %v1132_v7  ;;  %v461_v26 = vrot.slane %v1409_v25, 1  ;;  %v1010_v27 = vld [vmem:[%s1599_s11 + $0x1] ss:$0 sm:$0xff]  ;;  %v488_v23 = vld [vmem:[#allocation4] sm:$0xff] }
  0x2c   :  { %1137 = vmatprep.subr.bf16.mxu1 %v1136_v11 }
  0x2d   :  { %1068 = vmatpush3.msk.msra.mxu0 %vm93_vm1, %v81_v5  ;;  %464 = vrot.lane.b32.xlu1 %v461_v26, %s1261_s19  ;;  %vm480_vm1 = vcmask 58368  }
  0x2e   :  { %1070 = vmatmul.mubr.msk.f32.vlgmr.msra.gmra.mrb[0].mxu0 %vm86_vm0, %v78_v8  ;;  %1141 = vmatprep.subr.bf16.mxu0 %v1140_v14  ;;  %vm968_vm0 = vcmask 97344  }
  0x2f   :  { %1139 = vmatpush3.bf16.msra.mxu1 %v1136_v11  ;;  %1143 = vmatpush3.bf16.msra.mxu0 %v1140_v14 }
  0x30   :  { %1145 = vmatprep.subr.bf16.mxu0 %v1144_v24 }
  0x33   :  { %1147 = vmatpush3.bf16.msra.mxu0 %v1144_v24 }
 0x101   :  { %v1071_v16 = vpop.f32.mrb[0].mxu0 }
 0x102   :  { %v169_v17 = vadd.f32 %v1071_v16, %v1006_v15  ;;  %v163_v18 = vpop.f32.mrb[1].mxu0 }
 0x103   :  { %v164_v19 = vadd.f32 %v1006_v15, %v163_v18 }
 0x104   :  { %v173_v21 = vmax.f32 %v169_v17, 0.0 }
 0x105   :  { %v172_v20 = vmax.f32 %v164_v19, 0.0 }
 0x107   :  { %1080 = vmatprep.mubr.msk.f32.mxu1 %vm182_vm2, %v172_v20 }
 0x108   :  { %1081 = vmatmul.mubr.msk.f32.vlgmr.msra.gmra.mrb[0].mxu1 %vm182_vm2, %v173_v21  ;;  %v490_v21 = vld [vmem:[%s1595_s7] sm:$0xff] }
 0x109   :  { %v1148_v24 = vpack.c.bf16 %v491_v22, %v490_v21  ;;  %1098 = vmatprep.mubr.msk.f32.mxu1 %vm492_vm6, %v488_v23  ;;  %v661_v22 = vlaneseq }
 0x10b   :  { %1149 = vmatprep.subr.bf16.mxu1 %v1148_v24 }
 0x10c   :  { %1151 = vmatpush3.bf16.msra.mxu1 %v1148_v24  ;;  %v662_v24 = vshrl.u32 %v661_v22, 7 }
 0x1db   :  { %v1082_v28 = vpop.f32.mrb[0].mxu1 }
 0x1dc   :  { %v261_v29 = vadd.f32 %v1082_v28, %v1010_v27  ;;  %v255_v30 = vpop.f32.mrb[1].mxu1 }
 0x1dd   :  { %v256_v31 = vadd.f32 %v1010_v27, %v255_v30  ;;  %v1264_v30 = vmov 0.0  }
 0x1de   :  { %v265_v33 = vmax.f32 %v261_v29, 0.0  ;;  %v489_v29 = vld [vmem:[#allocation4 + $0x8] sm:$0xff]  ;;  %1101 = vmatprep.subr.mxu1 %v1264_v30 }
 0x1df   :  { %v264_v32 = vmax.f32 %v256_v31, 0.0  ;;  %1099 = vmatmul.mubr.msk.f32.vlgmr.msra.gmra.mrb[2].mxu1 %vm492_vm6, %v489_v29 }
 0x1e0   :  { %1103 = vmatprep.mubr.msk.f32.mxu1 %vm1265_vm7, %v1264_v30 }
 0x1e1   :  { %1091 = vmatprep.mubr.msk.f32.mxu0 %vm182_vm2, %v264_v32  ;;  %v574_v32 = vld [vmem:[%s1596_s8] sm:$0xff]  ;;  %s1268_s8 = smov 124  }
 0x1e2   :  { %1092 = vmatmul.mubr.msk.f32.vlgmr.msra.gmra.mrb[2].mxu0 %vm182_vm2, %v265_v33  ;;  %1102 = vmatpush3.msra.mxu1 %v574_v32 }
 0x2b5   :  { %v1093_v35 = vpop.f32.mrb[2].mxu0 }
 0x2b6   :  { %v352_v36 = vadd.f32 %v1093_v35, %v1013_v34  ;;  %v346_v37 = vpop.f32.mrb[3].mxu0 }
 0x2b7   :  { %v347_v38 = vadd.f32 %v1013_v34, %v346_v37 }
 0x2b8   :  { %v358_v39 = vand.u32 2147483647, %v352_v36  ;;  %v356_v59 = vmax.f32 %v352_v36, 0.0 }
 0x2b9   :  { %v357_v40 = vand.u32 2147483647, %v347_v38  ;;  %v355_v63 = vmax.f32 %v347_v38, 0.0 }
 0x2ba   :  { %v360_v41 = vsub.f32 0.0, %v358_v39 }
 0x2bb   :  { %v359_v42 = vsub.f32 0.0, %v357_v40 }
 0x2bc   :  { %v363_v43 = vmul.f32 1.442695, %v360_v41 }
 0x2bd   :  { %v361_v44 = vmul.f32 1.442695, %v359_v42 }
 0x2be   :  { %1179 = vpow2.f32 %v363_v43 }
 0x2bf   :  { %1181 = vpow2.f32 %v361_v44 }
 0x2c8   :  { %v1180_v45 = vpop.eup %1179 }
 0x2c9   :  { %v1182_v46 = vpop.eup %1181  ;;  %v374_v47 = vadd.f32 1.0, %v1180_v45  ;;  %v377_v49 = vmul.f32 -0.5, %v1180_v45  ;;  %v380_v52 = vand.u32 2147483647, %v1180_v45 }
 0x2ca   :  { %v365_v48 = vadd.f32 1.0, %v1182_v46  ;;  %v368_v50 = vmul.f32 -0.5, %v1182_v46  ;;  %v371_v54 = vand.u32 2147483647, %v1182_v46 }
 0x2cb   :  { %1183 = vlog2.f32 %v374_v47  ;;  %v378_v51 = vadd.f32 1.0, %v377_v49  ;;  %vm381_vm3 = vcmp.lt.f32.partialorder %v380_v52, 0.0004427343  ;;  %v465_v52 = vpop.permute.xlu1 %464 }
 0x2cc   :  { %1185 = vlog2.f32 %v365_v48  ;;  %v369_v53 = vadd.f32 1.0, %v368_v50  ;;  %vm372_vm4 = vcmp.lt.f32.partialorder %v371_v54, 0.0004427343 }
 0x2cd   :  { %v379_v58 = vmul.f32 %v1180_v45, %v378_v51 }
 0x2ce   :  { %v370_v61 = vmul.f32 %v1182_v46, %v369_v53 }
 0x2d5   :  { %v1184_v55 = vpop.eup %1183 }
 0x2d6   :  { %v1186_v56 = vpop.eup %1185  ;;  %v376_v57 = vmul.f32 0.6931472, %v1184_v55 }
 0x2d7   :  { %v367_v60 = vmul.f32 0.6931472, %v1186_v56 }
 0x2d8   :  { %v382_v62 = vsel %vm381_vm3, %v379_v58, %v376_v57  ;;  %vm979_vm3 = vcmask 130144  }
 0x2d9   :  { %v384_v0 = vadd.f32 %v382_v62, %v356_v59  ;;  %v373_v1 = vsel %vm372_vm4, %v370_v61, %v367_v60  ;;  %vm990_vm4 = vcmask 195712  }
 0x2da   :  { %v383_v2 = vadd.f32 %v373_v1, %v355_v63 }
 0x2db   :  { %v386_v3 = vmax.f32 %v384_v0, 1e-07 }
 0x2dc   :  { %v385_v4 = vmax.f32 %v383_v2, 1e-07 }
 0x2dd   :  { %1187 = vrcp.f32 %v386_v3 }
 0x2de   :  { %1189 = vrcp.f32 %v385_v4 }
 0x2e7   :  { %v1188_v5 = vpop.eup %1187 }
 0x2e8   :  { %414 = vrot.lane.b32.xlu0 %v1188_v5, %s1263_s23  ;;  %v1190_v6 = vpop.eup %1189  ;;  %v399_v33 = vsel %vm391_vm8, %v1188_v5, 0.0 }
 0x2e9   :  { %v400_v34 = vrot.slane %v399_v33, 4  ;;  %v392_v35 = vsel %vm391_vm8, %v1190_v6, 0.0 }
 0x2ea   :  { %v393_v37 = vrot.slane %v392_v35, 4 }
 0x2ec   :  { %412 = vrot.lane.b32.xlu0 %v1190_v6, %s1263_s23  ;;  %v394_v39 = vadd.f32 %v393_v37, %v392_v35 }
 0x2ee   :  { %v395_v41 = vrot.slane %v394_v39, 2 }
 0x2f0   :  { %v396_v43 = vadd.f32 %v395_v41, %v394_v39 }
 0x2f2   :  { %v397_v45 = vrot.slane %v396_v43, 1 }
 0x35a   :  { %v415_v7 = vpop.permute.xlu0 %414 }
 0x35b   :  { %v419_v8 = vmul.f32 %v415_v7, %v352_v36  ;;  %v401_v36 = vadd.f32 %v400_v34, %v399_v33  ;;  %v1489_v34 = vsub.s32 0, %v662_v24 }
 0x35d   :  { %v428_v9 = vsel %vm420_vm5, %v419_v8, 0.0  ;;  %v1100_v8 = vpop.f32.mrb[2].mxu1 }
 0x35e   :  { %v429_v10 = vrot.slane %v428_v9, 4  ;;  %v413_v11 = vpop.permute.xlu0 %412 }
 0x35f   :  { %v418_v12 = vmul.f32 %v413_v11, %v347_v38  ;;  %v402_v38 = vrot.slane %v401_v36, 2  ;;  %v694_v11 = vld [vmem:[%s1597_s9] sm:$0xff] }
 0x360   :  { %v430_v13 = vadd.f32 %v429_v10, %v428_v9  ;;  %v565_v9 = vpop.f32.mrb[3].mxu1 }
 0x361   :  { %v421_v14 = vsel %vm420_vm5, %v418_v12, 0.0  ;;  %v403_v40 = vadd.f32 %v402_v38, %v401_v36  ;;  %v695_v12 = vld [vmem:[%s1597_s9 + $0x8] sm:$0xff] }
 0x362   :  { %v422_v15 = vrot.slane %v421_v14, 4  ;;  %v431_v16 = vrot.slane %v430_v13, 2 }
 0x363   :  { %v404_v42 = vrot.slane %v403_v40, 1 }
 0x364   :  { %v423_v17 = vadd.f32 %v422_v15, %v421_v14  ;;  %v432_v18 = vadd.f32 %v431_v16, %v430_v13  ;;  %v1152_v13 = vpack.c.bf16 %v695_v12, %v694_v11  ;;  %v696_v14 = vld [vmem:[%s1597_s9 + $0x10] sm:$0xff]  ;;  %v697_v15 = vld [vmem:[%s1597_s9 + $0x18] sm:$0xff] }
 0x365   :  { %v405_v44 = vadd.f32 %v404_v42, %v403_v40  ;;  %v1156_v16 = vpack.c.bf16 %v697_v15, %v696_v14  ;;  %v787_v42 = vld [vmem:[%s1598_s10 + $0x10] sm:$0xff] }
 0x366   :  { %v433_v19 = vrot.slane %v432_v18, 1  ;;  %v424_v20 = vrot.slane %v423_v17, 2  ;;  %1153 = vmatprep.subr.bf16.mxu0 %v1152_v13 }
 0x367   :  { %1191 = vrcp.f32 %v405_v44  ;;  %1155 = vmatpush3.bf16.msra.mxu0 %v1152_v13 }
 0x368   :  { %v434_v26 = vadd.f32 %v433_v19, %v432_v18  ;;  %v425_v27 = vadd.f32 %v424_v20, %v423_v17  ;;  %1157 = vmatprep.subr.bf16.mxu0 %v1156_v16  ;;  %v785_v17 = vld [vmem:[%s1598_s10] sm:$0xff]  ;;  %v786_v18 = vld [vmem:[%s1598_s10 + $0x8] sm:$0xff]  ;;  %v1266_v20 = vmov 1966171168  }
 0x369   :  { %v1160_v19 = vpack.c.bf16 %v786_v18, %v785_v17  ;;  %v659_v21 = vunpack.c.l.s4 %v1266_v20 }
 0x36a   :  { %439 = vrot.lane.b32.xlu1 %v434_v26, %s1261_s19  ;;  %v426_v28 = vrot.slane %v425_v27, 1  ;;  %v1018_v26 = vld [vmem:[%s1599_s11 + $0x3] ss:$0 sm:$0xff] }
 0x36b   :  { %1159 = vmatpush3.bf16.msra.mxu0 %v1156_v16  ;;  %1161 = vmatprep.subr.bf16.mxu1 %v1160_v19  ;;  %v660_v23 = vunpack.c.0.s8 %v659_v21 }
 0x36c   :  { %v427_v31 = vadd.f32 %v426_v28, %v425_v27 }
 0x36d   :  { %v663_v27 = vsub.s32 %v660_v23, %v662_v24 }
 0x36e   :  { %462 = vrot.lane.b32.xlu1 %v1409_v25, %s1261_s19  ;;  %437 = vrot.lane.b32.xlu0 %v427_v31, %s1261_s19  ;;  %v398_v25 = vadd.f32 %v397_v45, %v396_v43  ;;  %v788_v43 = vld [vmem:[%s1598_s10 + $0x18] sm:$0xff]  ;;  %v1504_v45 = vld [vmem:[%s1591_s3 + $0x8] sm:$0xff] }
 0x36f   :  { %v1164_v44 = vpack.c.bf16 %v788_v43, %v787_v42 }
 0x370   :  { %1193 = vrcp.f32 %v398_v25  ;;  %v1509_v25 = vld [vmem:[%s1591_s3] sm:$0xff] }
 0x371   :  { %v1438_v46 = vpop.eup %1191 }
 0x372   :  { %1195 = vrsqrt.f32 %v1438_v46  ;;  %vm454_vm9 = vcmp.eq.f32.partialorder %v1438_v46, inf  ;;  %v457_v53 = vand.u32 2147483648, %v1438_v46  ;;  %vm456_vm10 = vcmp.eq.f32.partialorder %v1438_v46, 0.0  ;;  %886 = vrot.lane.b32.xlu1 %v1509_v25, %s1267_s29 }
 0x37a   :  { %v1441_v47 = vpop.eup %1193 }
 0x37b   :  { %1197 = vrsqrt.f32 %v1441_v47  ;;  %vm447_vm11 = vcmp.eq.f32.partialorder %v1441_v47, inf  ;;  %v450_v60 = vand.u32 2147483648, %v1441_v47  ;;  %vm449_vm12 = vcmp.eq.f32.partialorder %v1441_v47, 0.0 }
 0x37c   :  { %v1196_v48 = vpop.eup %1195 }
 0x37d   :  { %v453_v49 = vmul.f32 %v1196_v48, %v1438_v46  ;;  %v1020_v48 = vld [vmem:[%s1599_s11 + $0x4] ss:$0 sm:$0xff] }
 0x37f   :  { %v455_v51 = vsel %vm454_vm9, %v1438_v46, %v453_v49 }
 0x380   :  { %v458_v55 = vsel %vm456_vm10, %v457_v53, %v455_v51 }
 0x381   :  { %v469_v57 = vmul.f32 %v465_v52, %v458_v55  ;;  %v1023_v55 = vld [vmem:[%s1599_s11 + $0x5] ss:$0 sm:$0xff]  ;;  %s1269_s11 = smov 12  }
 0x385   :  { %v1198_v50 = vpop.eup %1197 }
 0x386   :  { %v446_v54 = vmul.f32 %v1198_v50, %v1441_v47 }
 0x388   :  { %v448_v59 = vsel %vm447_vm11, %v1441_v47, %v446_v54 }
 0x389   :  { %v451_v63 = vsel %vm449_vm12, %v450_v60, %v448_v59 }
 0x3dc   :  { %v440_v56 = vpop.permute.xlu1 %439 }
 0x3dd   :  { %v444_v58 = vmul.f32 %v1438_v46, %v440_v56 }
 0x3df   :  { %v1454_v61 = vadd.f32 %v469_v57, %v444_v58  ;;  %v474_v1 = vrot.slane %v444_v58, 7 }
 0x3e0   :  { %v463_v62 = vpop.permute.xlu1 %462  ;;  %v438_v0 = vpop.permute.xlu0 %437 }
 0x3e1   :  { %v468_v2 = vmul.f32 %v463_v62, %v451_v63  ;;  %v443_v3 = vmul.f32 %v1441_v47, %v438_v0  ;;  %v581_v4 = vrot.slane %v1454_v61, 7 }
 0x3e3   :  { %v1459_v5 = vadd.f32 %v468_v2, %v443_v3  ;;  %v1462_v6 = vsel %vm475_vm13, %v474_v1, %v443_v3 }
 0x3e5   :  { %v582_v7 = vsel %vm475_vm13, %v581_v4, %v1459_v5  ;;  %v887_v4 = vpop.permute.xlu1 %886 }
 0x3e6   :  { %583 = vrot.lane.b32.xlu0 %v582_v7, %s1263_s23 }
 0x3ea   :  { %888 = vrot.lane.b32.xlu0 %v1504_v45, %s1267_s29 }
 0x458   :  { %v584_v10 = vpop.permute.xlu0 %583 }
 0x459   :  { %1104 = vmatmul.mubr.msk.f32.vlgmr.msra.gmra.mrb[4].mxu1 %vm420_vm5, %v584_v10  ;;  %vm993_vm5 = vcmask 203968  }
 0x45a   :  { %1163 = vmatpush3.bf16.msra.mxu1 %v1160_v19 }
 0x45b   :  { %1165 = vmatprep.subr.bf16.mxu1 %v1164_v44 }
 0x45c   :  { %v889_v3 = vpop.permute.xlu0 %888 }
 0x45e   :  { %1167 = vmatpush3.bf16.msra.mxu1 %v1164_v44  ;;  %v948_v44 = vrot.slane %v1454_v61, %v1489_v34 }
 0x52c   :  { %v653_v28 = vpop.f32.mrb[4].mxu1 }
 0x52d   :  { %v654_v29 = vadd.f32 %v1018_v26, %v653_v28  ;;  %v1105_v30 = vpop.f32.mrb[5].mxu1  ;;  %v484_v28 = vsel %vm475_vm13, %v1438_v46, %v1441_v47 }
 0x52f   :  { %v664_v31 = vrot.slane %v654_v29, %v663_v27 }
 0x531   :  { %v665_v32 = vcombine.high %v664_v31, %v664_v31  ;;  %v672_v33 = vrot.slane %v664_v31, %v663_v27  ;;  %v907_v31 = vmul.f32 -0.5, %v1504_v45 }
 0x533   :  { %v679_v35 = vrot.slane %v665_v32, %v663_v27  ;;  %v683_v36 = vrot.slane %v672_v33, %v1489_v34  ;;  %v906_v32 = vmul.f32 -0.5, %v1509_v25  ;;  %v909_v33 = vmul.f32 %v907_v31, %v1504_v45 }
 0x534   :  { %v944_v45 = vrot.slane %v1459_v5, %v1489_v34 }
 0x535   :  { %v687_v37 = vrot.slane %v679_v35, %v1489_v34  ;;  %v690_v38 = vadd.f32 %v683_v36, %v565_v9  ;;  %v908_v46 = vmul.f32 %v906_v32, %v1509_v25 }
 0x537   :  { %v691_v39 = vadd.f32 %v1100_v8, %v687_v37  ;;  %v692_v40 = vmax.f32 %v690_v38, 0.0 }
 0x539   :  { %v693_v41 = vmax.f32 %v691_v39, 0.0  ;;  %1114 = vmatprep.mubr.msk.f32.mxu0 %vm182_vm2, %v692_v40 }
 0x53b   :  { %1115 = vmatmul.mubr.msk.f32.vlgmr.msra.gmra.mrb[4].mxu0 %vm182_vm2, %v693_v41 }
 0x60e   :  { %v1116_v49 = vpop.f32.mrb[4].mxu0 }
 0x60f   :  { %v780_v50 = vadd.f32 %v1116_v49, %v1020_v48  ;;  %v774_v51 = vpop.f32.mrb[5].mxu0 }
 0x610   :  { %v775_v52 = vadd.f32 %v1020_v48, %v774_v51 }
 0x611   :  { %v784_v54 = vmax.f32 %v780_v50, 0.0 }
 0x612   :  { %v783_v53 = vmax.f32 %v775_v52, 0.0 }
 0x614   :  { %1125 = vmatprep.mubr.msk.f32.mxu1 %vm182_vm2, %v783_v53 }
 0x615   :  { %1126 = vmatmul.mubr.msk.f32.vlgmr.msra.gmra.mrb[6].mxu1 %vm182_vm2, %v784_v54  ;;  %vm486_vm2 = vcmask 123968  }
 0x6e8   :  { %v1127_v56 = vpop.f32.mrb[6].mxu1 }
 0x6e9   :  { %v871_v57 = vadd.f32 %v1127_v56, %v1023_v55  ;;  %v865_v58 = vpop.f32.mrb[7].mxu1 }
 0x6ea   :  { %v866_v59 = vadd.f32 %v1023_v55, %v865_v58 }
 0x6eb   :  { %v875_v60 = vmax.f32 %v871_v57, -20.0 }
 0x6ec   :  { %v874_v62 = vmax.f32 %v866_v59, -20.0 }
 0x6ed   :  { %v877_v63 = vmin.f32 %v875_v60, 2.0 }
 0x6ee   :  { %v876_v0 = vmin.f32 %v874_v62, 2.0 }
 0x6ef   :  { %v880_v1 = vmul.f32 1.442695, %v877_v63 }
 0x6f0   :  { %v878_v2 = vmul.f32 1.442695, %v876_v0 }
 0x6f1   :  { %1199 = vpow2.f32 %v880_v1 }
 0x6f2   :  { %1201 = vpow2.f32 %v878_v2 }
 0x6fb   :  { %v1200_v7 = vpop.eup %1199 }
 0x6fc   :  { %v1202_v8 = vpop.eup %1201  ;;  %v893_v9 = vmul.f32 %v1200_v7, %v889_v3 }
 0x6fd   :  { %v892_v10 = vmul.f32 %v1202_v8, %v887_v4 }
 0x6fe   :  { %898 = vrot.lane.b32.xlu0 %v893_v9, %s1268_s8 }
 0x6ff   :  { %896 = vrot.lane.b32.xlu1 %v892_v10, %s1268_s8 }
 0x702   :  { %914 = vrot.lane.b32.xlu0 %v877_v63, %s1268_s8 }
 0x703   :  { %912 = vrot.lane.b32.xlu1 %v876_v0, %s1268_s8 }
 0x706   :  { %953 = vrot.lane.b32.xlu0 %v866_v59, %s1267_s29 }
 0x707   :  { %955 = vrot.lane.b32.xlu1 %v871_v57, %s1267_s29 }
 0x70a   :  { %964 = vrot.lane.b32.xlu0 %v877_v63, %s1267_s29 }
 0x70b   :  { %962 = vrot.lane.b32.xlu1 %v876_v0, %s1267_s29 }
 0x70f   :  { %477 = vrot.lane.b32.xlu1 %v1462_v6, %s1263_s23 }
 0x770   :  { %v899_v11 = vpop.permute.xlu0 %898 }
 0x771   :  { %v903_v12 = vadd.f32 %v899_v11, %v871_v57  ;;  %v897_v13 = vpop.permute.xlu1 %896 }
 0x772   :  { %v902_v14 = vadd.f32 %v897_v13, %v866_v59 }
 0x773   :  { %1203 = vtanh.f32 %v903_v12  ;;  %975 = vrot.lane.b32.xlu0 %v903_v12, %s1269_s11 }
 0x774   :  { %1205 = vtanh.f32 %v902_v14  ;;  %v915_v15 = vpop.permute.xlu0 %914  ;;  %973 = vrot.lane.b32.xlu1 %v902_v14, %s1269_s11 }
 0x775   :  { %v913_v16 = vpop.permute.xlu1 %912  ;;  %v919_v36 = vsub.f32 %v909_v33, %v915_v15 }
 0x776   :  { %v918_v39 = vsub.f32 %v908_v46, %v913_v16 }
 0x778   :  { %v954_v17 = vpop.permute.xlu0 %953 }
 0x779   :  { %v956_v18 = vpop.permute.xlu1 %955 }
 0x77c   :  { %v965_v22 = vpop.permute.xlu0 %964 }
 0x77d   :  { %v1204_v19 = vpop.eup %1203  ;;  %v963_v20 = vpop.permute.xlu1 %962 }
 0x77e   :  { %v1206_v21 = vpop.eup %1205  ;;  %950 = vst.msk [vmem:[%s1601_s13 + $0x8] sm:$0xff] %vm932_vm14, %v1204_v19  ;;  %v921_v6 = vmul.f32 %v1204_v19, %v1204_v19 }
 0x77f   :  { %949 = vst.msk [vmem:[%s1601_s13] sm:$0xff] %vm932_vm14, %v1206_v21  ;;  %v920_v23 = vmul.f32 %v1206_v21, %v1206_v21 }
 0x780   :  { %961 = vst.msk [vmem:[%s1601_s13 + $0x8] sm:$0xff] %vm959_vm15, %v956_v18  ;;  %960 = vst.msk [vmem:[%s1601_s13] sm:$0xff] %vm959_vm15, %v954_v17  ;;  %v923_v24 = vsub.f32 1.0, %v921_v6 }
 0x781   :  { %970 = vst.msk [vmem:[%s1601_s13 + $0x8] sm:$0xff] %vm968_vm0, %v965_v22  ;;  %969 = vst.msk [vmem:[%s1601_s13] sm:$0xff] %vm968_vm0, %v963_v20  ;;  %v478_v26 = vpop.permute.xlu1 %477  ;;  %v922_v27 = vsub.f32 1.0, %v920_v23 }
 0x782   :  { %481 = vst.msk [vmem:[%s1600_s12] sm:$0x3] %vm480_vm1, %v478_v26  ;;  %v925_v29 = vadd.f32 1e-06, %v923_v24 }
 0x783   :  { %487 = vst.msk [vmem:[%s1600_s12] sm:$0x3] %vm486_vm2, %v484_v28  ;;  %v924_v30 = vadd.f32 1e-06, %v922_v27 }
 0x784   :  { %1207 = vlog2.f32 %v925_v29 }
 0x785   :  { %1209 = vlog2.f32 %v924_v30 }
 0x78e   :  { %v1208_v47 = vpop.eup %1207 }
 0x78f   :  { %v1210_v35 = vpop.eup %1209  ;;  %v929_v37 = vmul.f32 0.6931472, %v1208_v47 }
 0x790   :  { %v927_v38 = vmul.f32 0.6931472, %v1210_v35 }
 0x791   :  { %v931_v40 = vsub.f32 %v919_v36, %v929_v37 }
 0x792   :  { %v930_v42 = vsub.f32 %v918_v39, %v927_v38 }
 0x793   :  { %v936_v41 = vsel %vm932_vm14, %v931_v40, 0.0 }
 0x794   :  { %937 = vadd.xlane.f32.xlu0 %v936_v41  ;;  %v933_v43 = vsel %vm932_vm14, %v930_v42, 0.0 }
 0x798   :  { %934 = vadd.xlane.f32.xlu1 %v933_v43 }
 0x7a9   :  { %986 = vrot.lane.b32.xlu1 %v948_v44, %s1261_s19 }
 0x7aa   :  { %984 = vrot.lane.b32.xlu0 %v944_v45, %s1261_s19 }
 0x7e5   :  { %v976_v25 = vpop.permute.xlu0 %975 }
 0x7e6   :  { %981 = vst.msk [vmem:[%s1601_s13 + $0x8] sm:$0xff] %vm979_vm3, %v976_v25  ;;  %v974_v48 = vpop.permute.xlu1 %973 }
 0x7e7   :  { %980 = vst.msk [vmem:[%s1601_s13] sm:$0xff] %vm979_vm3, %v974_v48 }
 0x821   :  { %v938_v49 = vpop.xlane.xlu0 %937 }
 0x822   :  { %v1027_v50 = vadd.f32 -3.675754, %v938_v49 }
 0x825   :  { %v985_v61 = vpop.permute.xlu0 %984  ;;  %v935_v5 = vpop.xlane.xlu1 %934 }
 0x826   :  { %991 = vst.msk [vmem:[%s1601_s13] sm:$0xff] %vm990_vm4, %v985_v61  ;;  %v1026_v34 = vadd.f32 -3.675754, %v935_v5 }
 0x828   :  { %994 = vst.msk [vmem:[%s1601_s13] sm:$0xff] %vm993_vm5, %v1026_v34 }
 0x829   :  { %v987_v51 = vpop.permute.xlu1 %986 }
 0x82a   :  { %992 = vst.msk [vmem:[%s1601_s13 + $0x8] sm:$0xff] %vm990_vm4, %v987_v51 }
 0x82b   :  { %995 = vst.msk [vmem:[%s1601_s13 + $0x8] sm:$0xff] %vm993_vm5, %v1027_v50 }
 0x82c   :  { %1004 = vsyncpa [#allocation3], 1 }
 0x82d   :  { %1005 = vsyncpa [#allocation5], 1 }

</bundles_post_ra>
